<compile_context>
chip_gen: v7x
topology: tpu7x:2x2x1
jax: 0.10.0
libtpu: 0.0.40
codegen_flags: <defaults>
</compile_context>

<pallas_src>
import jax
import jax.numpy as jnp
from jax.experimental import pallas as pl
from jax.experimental.pallas import tpu as pltpu


def _round_up(x, m):
    return (x + m - 1) // m * m


def gcr_kernel(zt_ref, y_ref, wdec_ref, bdec_ref, wcls_ref, bcls_ref, out_ref):
    """One batch tile; batch is on the lane (minor) axis throughout."""
    zt = zt_ref[...]                                          # (L, TB) f32
    # --- g.vae(z): x^T = tanh(W_dec^T @ z^T + b_dec) ------------------------
    x_t = jnp.dot(wdec_ref[...], zt.astype(jnp.bfloat16),
                  preferred_element_type=jnp.float32)         # (D, TB) f32 acc
    x_t = jnp.tanh(x_t + bdec_ref[...])                       # f32 elementwise
    # --- C(x): logits^T = W_cls^T @ x^T + b_cls -----------------------------
    logits_t = jnp.dot(wcls_ref[...], x_t.astype(jnp.bfloat16),
                       preferred_element_type=jnp.float32)    # (K, TB)
    logits_t = logits_t + bcls_ref[...]
    # --- torch.gather(logits, 1, y) + logits.logsumexp(1), class axis = 0 ---
    y_row = y_ref[...]                                        # (1, TB) int32
    class_ids = jax.lax.broadcasted_iota(jnp.int32, logits_t.shape, 0)
    onehot = class_ids == y_row                               # (K, TB) bool
    m = jnp.max(logits_t, axis=0, keepdims=True)              # (1, TB)
    shifted = logits_t - m                                    # reused twice
    sel_minus_m = jnp.sum(jnp.where(onehot, shifted, 0.0), axis=0, keepdims=True)
    log_sum = jnp.log(jnp.sum(jnp.exp(shifted), axis=0, keepdims=True))
    # --- 0.5 * ||z||^2 -------------------------------------------------------
    znorm2 = jnp.sum(zt * zt, axis=0, keepdims=True)          # (1, TB)
    # (sel - m) - log_sum == sel - logsumexp ; lane-dense (1, TB) store
    out_ref[...] = sel_minus_m - log_sum - 0.5 * znorm2


def gcr_forward(z, y, w_dec, b_dec, w_cls, b_cls):
    """z: (B, L) f32, y: (B,) int -> energy (B,) f32."""
    B, L = z.shape
    D, K = w_cls.shape
    assert w_dec.shape == (L, D)

    # Batch tile: whole (8-rounded) batch if small, else 256-wide lane tiles.
    TB = _round_up(B, 8) if B <= 256 else 256
    Bp = _round_up(B, TB)
    grid = (Bp // TB,)

    # Pad batch and put it on the lane (last) axis.
    zp = jnp.pad(z.astype(jnp.float32), ((0, Bp - B), (0, 0)))
    yp = jnp.pad(y.astype(jnp.int32), (0, Bp - B))
    zt = zp.T                                    # (L, Bp) f32
    yt = yp.reshape(1, Bp)                       # (1, Bp) int32
    # Weights transposed + pre-cast to bf16 (MXU-native); biases stay f32.
    wdec_t = w_dec.T.astype(jnp.bfloat16)        # (D, L)
    wcls_t = w_cls.T.astype(jnp.bfloat16)        # (K, D)
    bdec_c = b_dec.reshape(D, 1).astype(jnp.float32)
    bcls_c = b_cls.reshape(K, 1).astype(jnp.float32)

    cost = pl.CostEstimate(
        flops=2 * Bp * (L * D + D * K),
        transcendentals=Bp * (D + K),
        bytes_accessed=(zt.size * 4 + yt.size * 4 + wdec_t.size * 2
                        + wcls_t.size * 2 + bdec_c.size * 4 + bcls_c.size * 4
                        + Bp * 4),
    )

    out = pl.pallas_call(
        gcr_kernel,
        out_shape=jax.ShapeDtypeStruct((1, Bp), jnp.float32),
        grid=grid,
        in_specs=[
            pl.BlockSpec((L, TB), lambda i: (0, i)),   # z^T tile (batch on lanes)
            pl.BlockSpec((1, TB), lambda i: (0, i)),   # y tile
            pl.BlockSpec((D, L), lambda i: (0, 0)),    # W_dec^T  (VMEM-resident)
            pl.BlockSpec((D, 1), lambda i: (0, 0)),    # b_dec    (VMEM-resident)
            pl.BlockSpec((K, D), lambda i: (0, 0)),    # W_cls^T  (VMEM-resident)
            pl.BlockSpec((K, 1), lambda i: (0, 0)),    # b_cls    (VMEM-resident)
        ],
        out_specs=pl.BlockSpec((1, TB), lambda i: (0, i)),   # lane-dense energies
        compiler_params=pltpu.CompilerParams(
            dimension_semantics=("parallel",)),              # megacore on v7x
        cost_estimate=cost,
    )(zt, yt, wdec_t, bdec_c, wcls_t, bcls_c)
    return out[0, :B]


def gcr_forward_ref(z, y, w_dec, b_dec, w_cls, b_cls):
    """Pure-JAX f32 reference mirroring the PyTorch forward."""
    x = jnp.tanh(z @ w_dec + b_dec)
    logits = x @ w_cls + b_cls
    sel = jnp.take_along_axis(logits, y[:, None], axis=1)[:, 0]
    lse = jax.scipy.special.logsumexp(logits, axis=1)
    return sel - lse - 0.5 * jnp.sum(z * z, axis=1)


if __name__ == "__main__":
    # small, module-consistent shapes
    B = 8            # batch
    L = 32           # latent_dim
    C_img, H, W = 4, 8, 8
    D = C_img * H * W   # flattened decoded-image size (NCHW flattened)
    K = 16           # number of classes

    key = jax.random.PRNGKey(0)
    kz, ky, k1, k2, k3, k4, kz2, ky2 = jax.random.split(key, 8)

    z = jax.random.normal(kz, (B, L), dtype=jnp.float32)
    y = jax.random.randint(ky, (B,), 0, K, dtype=jnp.int32)

    # deterministic parameter init (synthetic "g.vae" decoder + classifier "C")
    w_dec = jax.random.normal(k1, (L, D), dtype=jnp.float32) * 0.05
    b_dec = jax.random.normal(k2, (D,), dtype=jnp.float32) * 0.01
    w_cls = jax.random.normal(k3, (D, K), dtype=jnp.float32) * 0.05
    b_cls = jax.random.normal(k4, (K,), dtype=jnp.float32) * 0.01

    # --- small-batch check (single grid step) --------------------------------
    energy = gcr_forward(z, y, w_dec, b_dec, w_cls, b_cls)
    jax.block_until_ready(energy)
    ref = gcr_forward_ref(z, y, w_dec, b_dec, w_cls, b_cls)
    assert energy.shape == (B,)
    # bf16 MXU operands (f32 accumulation) -> loosened tolerance vs f32 ref.
    assert jnp.allclose(energy, ref, atol=2e-2, rtol=2e-2), (energy, ref)

    # --- larger batch exercising the batch grid (TB=256, 2 steps, padding) ---
    B2 = 272
    z2 = jax.random.normal(kz2, (B2, L), dtype=jnp.float32)
    y2 = jax.random.randint(ky2, (B2,), 0, K, dtype=jnp.int32)
    energy2 = gcr_forward(z2, y2, w_dec, b_dec, w_cls, b_cls)
    jax.block_until_ready(energy2)
    ref2 = gcr_forward_ref(z2, y2, w_dec, b_dec, w_cls, b_cls)
    assert energy2.shape == (B2,)
    assert jnp.allclose(energy2, ref2, atol=2e-2, rtol=2e-2), (energy2, ref2)

    print("KERNEL_OK")
</pallas_src>

<mosaic_0001>
module attributes {stable_mosaic.version = 11 : i64} {
  func.func @gcr_kernel(%arg0: i32, %arg1: memref<32x8xf32, #tpu.memory_space<vmem>>, %arg2: memref<1x8xi32, #tpu.memory_space<vmem>>, %arg3: memref<256x32xbf16, #tpu.memory_space<vmem>>, %arg4: memref<256x1xf32, #tpu.memory_space<vmem>>, %arg5: memref<16x256xbf16, #tpu.memory_space<vmem>>, %arg6: memref<16x1xf32, #tpu.memory_space<vmem>>, %arg7: memref<1x8xf32, #tpu.memory_space<vmem>>) attributes {dimension_semantics = [#tpu.dimension_semantics<parallel>], iteration_bounds = array<i64: 1>, scalar_prefetch = 0 : i64, scratch_operands = 0 : i64, tpu.core_type = #tpu.core_type<tc>, window_params = [{transform_indices = @transform_0, window_bounds = array<i64: 32, 8>}, {transform_indices = @transform_1, window_bounds = array<i64: 1, 8>}, {pipeline_mode = #tpu.pipeline_mode<synchronous>, transform_indices = @transform_2, window_bounds = array<i64: 256, 32>}, {pipeline_mode = #tpu.pipeline_mode<synchronous>, transform_indices = @transform_3, window_bounds = array<i64: 256, 1>}, {pipeline_mode = #tpu.pipeline_mode<synchronous>, transform_indices = @transform_4, window_bounds = array<i64: 16, 256>}, {pipeline_mode = #tpu.pipeline_mode<synchronous>, transform_indices = @transform_5, window_bounds = array<i64: 16, 1>}, {transform_indices = @transform_6, window_bounds = array<i64: 1, 8>}]} {
    %c0 = arith.constant 0 : index
    %c0_0 = arith.constant 0 : index
    %0 = vector.load %arg1[%c0, %c0_0] : memref<32x8xf32, #tpu.memory_space<vmem>>, vector<32x8xf32>
    %c0_1 = arith.constant 0 : index
    %c0_2 = arith.constant 0 : index
    %1 = vector.load %arg3[%c0_1, %c0_2] : memref<256x32xbf16, #tpu.memory_space<vmem>>, vector<256x32xbf16>
    %2 = arith.truncf %0 : vector<32x8xf32> to vector<32x8xbf16>
    %cst = arith.constant dense<0.000000e+00> : vector<256x8xf32>
    %3 = tpu.matmul %1, %2, %cst {dimension_numbers = #tpu.dot_dimension_numbers<[1], [0], [0], [1], [0, 0, 1, 1], [], []>} : vector<256x32xbf16>, vector<32x8xbf16>, vector<256x8xf32> -> vector<256x8xf32>
    %c0_3 = arith.constant 0 : index
    %c0_4 = arith.constant 0 : index
    %4 = vector.load %arg4[%c0_3, %c0_4] : memref<256x1xf32, #tpu.memory_space<vmem>>, vector<256x1xf32>
    %5 = vector.broadcast %4 : vector<256x1xf32> to vector<256x8xf32>
    %6 = arith.addf %3, %5 : vector<256x8xf32>
    %7 = math.tanh %6 : vector<256x8xf32>
    %c0_5 = arith.constant 0 : index
    %c0_6 = arith.constant 0 : index
    %8 = vector.load %arg5[%c0_5, %c0_6] : memref<16x256xbf16, #tpu.memory_space<vmem>>, vector<16x256xbf16>
    %9 = arith.truncf %7 : vector<256x8xf32> to vector<256x8xbf16>
    %cst_7 = arith.constant dense<0.000000e+00> : vector<16x8xf32>
    %10 = tpu.matmul %8, %9, %cst_7 {dimension_numbers = #tpu.dot_dimension_numbers<[1], [0], [0], [1], [0, 0, 1, 1], [], []>} : vector<16x256xbf16>, vector<256x8xbf16>, vector<16x8xf32> -> vector<16x8xf32>
    %c0_8 = arith.constant 0 : index
    %c0_9 = arith.constant 0 : index
    %11 = vector.load %arg6[%c0_8, %c0_9] : memref<16x1xf32, #tpu.memory_space<vmem>>, vector<16x1xf32>
    %12 = vector.broadcast %11 : vector<16x1xf32> to vector<16x8xf32>
    %13 = arith.addf %10, %12 : vector<16x8xf32>
    %c0_10 = arith.constant 0 : index
    %c0_11 = arith.constant 0 : index
    %14 = vector.load %arg2[%c0_10, %c0_11] : memref<1x8xi32, #tpu.memory_space<vmem>>, vector<1x8xi32>
    %15 = tpu.iota {dimensions = array<i32: 0>} : vector<16x8xi32>
    %16 = vector.broadcast %14 : vector<1x8xi32> to vector<16x8xi32>
    %17 = arith.cmpi eq, %15, %16 : vector<16x8xi32>
    %cst_12 = arith.constant dense<0xFF800000> : vector<8xf32>
    %18 = vector.multi_reduction <maximumf>, %13, %cst_12 [0] : vector<16x8xf32> to vector<8xf32>
    %19 = vector.shape_cast %18 : vector<8xf32> to vector<1x8xf32>
    %20 = vector.broadcast %19 : vector<1x8xf32> to vector<16x8xf32>
    %21 = arith.subf %13, %20 : vector<16x8xf32>
    %cst_13 = arith.constant 0.000000e+00 : f32
    %22 = vector.broadcast %cst_13 : f32 to vector<16x8xf32>
    %23 = arith.select %17, %21, %22 : vector<16x8xi1>, vector<16x8xf32>
    %cst_14 = arith.constant dense<0.000000e+00> : vector<8xf32>
    %24 = vector.multi_reduction <add>, %23, %cst_14 [0] : vector<16x8xf32> to vector<8xf32>
    %25 = vector.shape_cast %24 : vector<8xf32> to vector<1x8xf32>
    %26 = math.exp %21 : vector<16x8xf32>
    %cst_15 = arith.constant dense<0.000000e+00> : vector<8xf32>
    %27 = vector.multi_reduction <add>, %26, %cst_15 [0] : vector<16x8xf32> to vector<8xf32>
    %28 = vector.shape_cast %27 : vector<8xf32> to vector<1x8xf32>
    %29 = math.log %28 : vector<1x8xf32>
    %30 = arith.mulf %0, %0 : vector<32x8xf32>
    %cst_16 = arith.constant dense<0.000000e+00> : vector<8xf32>
    %31 = vector.multi_reduction <add>, %30, %cst_16 [0] : vector<32x8xf32> to vector<8xf32>
    %32 = vector.shape_cast %31 : vector<8xf32> to vector<1x8xf32>
    %33 = arith.subf %25, %29 : vector<1x8xf32>
    %cst_17 = arith.constant 5.000000e-01 : f32
    %34 = vector.broadcast %cst_17 : f32 to vector<1x8xf32>
    %35 = arith.mulf %34, %32 : vector<1x8xf32>
    %36 = arith.subf %33, %35 : vector<1x8xf32>
    %c0_18 = arith.constant 0 : index
    %c0_19 = arith.constant 0 : index
    %37 = vector.load %arg7[%c0_18, %c0_19] : memref<1x8xf32, #tpu.memory_space<vmem>>, vector<1x8xf32>
    tpu.vector_store %arg7[%c0_18, %c0_19], %36 {strides = array<i32>} : memref<1x8xf32, #tpu.memory_space<vmem>>, vector<1x8xf32>,
    return
  }
  func.func @transform_0(%arg0: i32) -> (i32, i32) {
    %c0_i32 = arith.constant 0 : i32
    %c0_i32_0 = arith.constant 0 : i32
    return %c0_i32, %arg0 : i32, i32
  }
  func.func @transform_1(%arg0: i32) -> (i32, i32) {
    %c0_i32 = arith.constant 0 : i32
    %c0_i32_0 = arith.constant 0 : i32
    return %c0_i32, %arg0 : i32, i32
  }
  func.func @transform_2(%arg0: i32) -> (i32, i32) {
    %c0_i32 = arith.constant 0 : i32
    %c0_i32_0 = arith.constant 0 : i32
    %c0_i32_1 = arith.constant 0 : i32
    return %c0_i32, %c0_i32_0 : i32, i32
  }
  func.func @transform_3(%arg0: i32) -> (i32, i32) {
    %c0_i32 = arith.constant 0 : i32
    %c0_i32_0 = arith.constant 0 : i32
    %c0_i32_1 = arith.constant 0 : i32
    return %c0_i32, %c0_i32_0 : i32, i32
  }
  func.func @transform_4(%arg0: i32) -> (i32, i32) {
    %c0_i32 = arith.constant 0 : i32
    %c0_i32_0 = arith.constant 0 : i32
    %c0_i32_1 = arith.constant 0 : i32
    return %c0_i32, %c0_i32_0 : i32, i32
  }
  func.func @transform_5(%arg0: i32) -> (i32, i32) {
    %c0_i32 = arith.constant 0 : i32
    %c0_i32_0 = arith.constant 0 : i32
    %c0_i32_1 = arith.constant 0 : i32
    return %c0_i32, %c0_i32_0 : i32, i32
  }
  func.func @transform_6(%arg0: i32) -> (i32, i32) {
    %c0_i32 = arith.constant 0 : i32
    %c0_i32_0 = arith.constant 0 : i32
    return %c0_i32, %arg0 : i32, i32
  }
}

</mosaic_0001>

<bundles_post_ra>
// kernel: tpu_custom_call.1
= control target key start
LH: loop header
LB: loop body
LE: loop exit
PB: predicated region body
PF: predicated region fallthrough
CT: control target
= control target key end

     0   :  { %vm335_vm0 = vcmask 261120   ;;  %v970_v8 = vmov 0   ;;  %vm668_vm1 = vcmask 64512   ;;  %s1340_s0 = inlined_call_operand.vmem [shape: f32[32,8], index: 0, kind: input, shape index: {}]   ;;  %s1341_s1 = inlined_call_operand.vmem [shape: s32[1,8], index: 1, kind: input, shape index: {}]   ;;  %s1342_s2 = inlined_call_operand.vmem [shape: bf16[256,32], index: 2, kind: input, shape index: {}]   ;;  %s1343_s3 = inlined_call_operand.vmem [shape: f32[256,1], index: 3, kind: input, shape index: {}]   ;;  %s1344_s4 = inlined_call_operand.vmem [shape: bf16[16,256], index: 4, kind: input, shape index: {}]   ;;  %s1345_s5 = inlined_call_operand.vmem [shape: f32[16,1], index: 5, kind: input, shape index: {}]   ;;  %s1346_s6 = inlined_call_operand.hbm [shape: f32[1,8], index: 6, kind: output, shape index: {}]  }
   0x1   :  { %v25_v0 = vld [vmem:[%s1340_s0] sm:$0xff]  ;;  %v26_v1 = vld [vmem:[%s1340_s0 + $0x8] sm:$0xff]  ;;  %v27_v2 = vld [vmem:[%s1340_s0 + $0x10] sm:$0xff]  ;;  %856 = vset.pattern.permute.xlu1 %v970_v8  ;;  %855 = vset.pattern.permute.xlu0 %v970_v8 }
   0x2   :  { %v61_v3 = vpack.c.bf16 %v26_v1, %v25_v0  ;;  %v706_v4 = vmul.f32 %v25_v0, %v25_v0  ;;  %v707_v5 = vmul.f32 %v26_v1, %v26_v1  ;;  %v28_v6 = vld [vmem:[%s1340_s0 + $0x18] sm:$0xff]  ;;  %v708_v7 = vmul.f32 %v27_v2, %v27_v2  ;;  %v857_v11 = vld [vmem:[%s1342_s2] sm:$0xff]   ;;  %v858_v18 = vld [vmem:[%s1342_s2 + $0x8] sm:$0xff]  }
   0x3   :  { %v62_v9 = vpack.c.bf16 %v28_v6, %v27_v2  ;;  %v709_v10 = vmul.f32 %v28_v6, %v28_v6  ;;  %821 = vmatprep.mubr.msk.bf16.mxu0 %vm335_vm0, %v857_v11  ;;  %v859_v20 = vld [vmem:[%s1342_s2 + $0x10] sm:$0xff]   ;;  %v79_v21 = vld [vmem:[%s1343_s3 + $0x80] sm:$0xff]  ;;  %v80_v23 = vld [vmem:[%s1343_s3 + $0x88] sm:$0xff] }
   0x4   :  { %817 = vmatprep.subr.bf16.mxu0 %v61_v3  ;;  %v710_v12 = vsel %vm668_vm1, %v706_v4, 0.0  ;;  %v711_v13 = vsel %vm668_vm1, %v707_v5, 0.0  ;;  %v713_v14 = vsel %vm668_vm1, %v708_v7, 0.0  ;;  %177 = vperm.xlu0 %855, %v79_v21   ;;  %v63_v22 = vld [vmem:[%s1343_s3] sm:$0xff]  ;;  %v64_v24 = vld [vmem:[%s1343_s3 + $0x8] sm:$0xff]  ;;  %v81_v25 = vld [vmem:[%s1343_s3 + $0x90] sm:$0xff] }
   0x5   :  { %v712_v15 = vadd.f32 %v711_v13, %v710_v12  ;;  %818 = vmatpush3.bf16.msra.mxu0 %v61_v3  ;;  %v715_v16 = vsel %vm668_vm1, %v709_v10, 0.0  ;;  %97 = vperm.xlu1 %856, %v63_v22   ;;  %v860_v26 = vld [vmem:[%s1342_s2 + $0x18] sm:$0xff]   ;;  %v861_v28 = vld [vmem:[%s1342_s2 + $0x20] sm:$0xff]   ;;  %v65_v29 = vld [vmem:[%s1343_s3 + $0x10] sm:$0xff] }
   0x6   :  { %819 = vmatprep.subr.bf16.mxu0 %v62_v9  ;;  %v82_v27 = vld [vmem:[%s1343_s3 + $0x98] sm:$0xff]  ;;  %v83_v31 = vld [vmem:[%s1343_s3 + $0xa0] sm:$0xff]  ;;  %v862_v32 = vld [vmem:[%s1342_s2 + $0x28] sm:$0xff]  }
   0x7   :  { %v714_v17 = vadd.f32 %v713_v14, %v712_v15  ;;  %v66_v30 = vld [vmem:[%s1343_s3 + $0x18] sm:$0xff]  ;;  %v84_v33 = vld [vmem:[%s1343_s3 + $0xa8] sm:$0xff]  ;;  %v863_v34 = vld [vmem:[%s1342_s2 + $0x30] sm:$0xff]  }
   0x8   :  { %182 = vperm.xlu0 %855, %v80_v23   ;;  %v67_v35 = vld [vmem:[%s1343_s3 + $0x20] sm:$0xff]  ;;  %v68_v36 = vld [vmem:[%s1343_s3 + $0x28] sm:$0xff] }
   0x9   :  { %v1030_v19 = vadd.f32 %v715_v16, %v714_v17  ;;  %820 = vmatpush3.bf16.msra.mxu0 %v62_v9  ;;  %102 = vperm.xlu1 %856, %v64_v24  }
   0xc   :  { %822 = vmatmul.mubr.msk.bf16.vlgmr.msra.gmra.mrb[0].mxu0 %vm335_vm0, %v858_v18  ;;  %187 = vperm.xlu0 %855, %v81_v25  }
   0xd   :  { %825 = vmatprep.mubr.msk.bf16.mxu0 %vm335_vm0, %v859_v20  ;;  %192 = vperm.xlu1 %856, %v82_v27  }
  0x10   :  { %107 = vperm.xlu0 %855, %v65_v29  }
  0x11   :  { %112 = vperm.xlu1 %856, %v66_v30  }
  0x14   :  { %826 = vmatmul.mubr.msk.bf16.gmra.mrb[4].mxu0 %vm335_vm0, %v860_v26  ;;  %197 = vperm.xlu0 %855, %v83_v31  }
  0x15   :  { %829 = vmatprep.mubr.msk.bf16.mxu0 %vm335_vm0, %v861_v28  ;;  %202 = vperm.xlu1 %856, %v84_v33  }
  0x18   :  { %117 = vperm.xlu0 %855, %v67_v35  }
  0x1c   :  { %830 = vmatmul.mubr.msk.bf16.gmra.mrb[8].mxu0 %vm335_vm0, %v862_v32 }
  0x1d   :  { %833 = vmatprep.mubr.msk.bf16.mxu0 %vm335_vm0, %v863_v34 }
  0x1e   :  { %11 = vsyncpa [#allocation3], 0  ;;  %122 = vperm.xlu1 %856, %v68_v36   ;;  %v85_v37 = vld [vmem:[%s1343_s3 + $0xb0] sm:$0xff]  ;;  %v864_v38 = vld [vmem:[%s1342_s2 + $0x38] sm:$0xff]   ;;  %vm726_vm4 = vcmask 57344  }
  0x1f   :  { %v86_v39 = vld [vmem:[%s1343_s3 + $0xb8] sm:$0xff]  ;;  %v865_v40 = vld [vmem:[%s1342_s2 + $0x40] sm:$0xff]   ;;  %207 = vperm.xlu0 %855, %v85_v37   ;;  %v69_v41 = vld [vmem:[%s1343_s3 + $0x30] sm:$0xff] }
  0x20   :  { %v70_v42 = vld [vmem:[%s1343_s3 + $0x38] sm:$0xff]  ;;  %v87_v43 = vld [vmem:[%s1343_s3 + $0xc0] sm:$0xff]  ;;  %v866_v44 = vld [vmem:[%s1342_s2 + $0x48] sm:$0xff]  }
  0x21   :  { %v88_v45 = vld [vmem:[%s1343_s3 + $0xc8] sm:$0xff]  ;;  %v867_v46 = vld [vmem:[%s1342_s2 + $0x50] sm:$0xff]   ;;  %v71_v47 = vld [vmem:[%s1343_s3 + $0x40] sm:$0xff] }
  0x22   :  { %212 = vperm.xlu1 %856, %v86_v39   ;;  %v72_v48 = vld [vmem:[%s1343_s3 + $0x48] sm:$0xff]  ;;  %v89_v49 = vld [vmem:[%s1343_s3 + $0xd0] sm:$0xff]  ;;  %v868_v50 = vld [vmem:[%s1342_s2 + $0x58] sm:$0xff]  }
  0x23   :  { %127 = vperm.xlu0 %855, %v69_v41   ;;  %v90_v51 = vld [vmem:[%s1343_s3 + $0xd8] sm:$0xff]  ;;  %v869_v52 = vld [vmem:[%s1342_s2 + $0x60] sm:$0xff]   ;;  %v73_v53 = vld [vmem:[%s1343_s3 + $0x50] sm:$0xff] }
  0x24   :  { %834 = vmatmul.mubr.msk.bf16.gmra.mrb[12].mxu0 %vm335_vm0, %v864_v38  ;;  %v74_v54 = vld [vmem:[%s1343_s3 + $0x58] sm:$0xff]  ;;  %v91_v55 = vld [vmem:[%s1343_s3 + $0xe0] sm:$0xff]  ;;  %v870_v56 = vld [vmem:[%s1342_s2 + $0x68] sm:$0xff]  }
  0x25   :  { %837 = vmatprep.mubr.msk.bf16.mxu0 %vm335_vm0, %v865_v40  ;;  %v92_v57 = vld [vmem:[%s1343_s3 + $0xe8] sm:$0xff]  ;;  %v871_v58 = vld [vmem:[%s1342_s2 + $0x70] sm:$0xff]   ;;  %v75_v59 = vld [vmem:[%s1343_s3 + $0x60] sm:$0xff] }
  0x26   :  { %132 = vperm.xlu1 %856, %v70_v42   ;;  %v76_v60 = vld [vmem:[%s1343_s3 + $0x68] sm:$0xff]  ;;  %v93_v61 = vld [vmem:[%s1343_s3 + $0xf0] sm:$0xff]  ;;  %v872_v62 = vld [vmem:[%s1342_s2 + $0x78] sm:$0xff]  }
  0x27   :  { %217 = vperm.xlu0 %855, %v87_v43   ;;  %v94_v63 = vld [vmem:[%s1343_s3 + $0xf8] sm:$0xff]  ;;  %v77_v0 = vld [vmem:[%s1343_s3 + $0x70] sm:$0xff]  ;;  %v595_v2 = vld [vmem:[%s1345_s5] sm:$0xff] }
  0x28   :  { %v78_v1 = vld [vmem:[%s1343_s3 + $0x78] sm:$0xff]  ;;  %v596_v3 = vld [vmem:[%s1345_s5 + $0x8] sm:$0xff] }
  0x29   :  { %v875_v11 = vld [vmem:[%s1344_s4 + $0x4] ss:$8 sps:$4 sm:$0xff]  }
  0x2a   :  { %222 = vperm.xlu1 %856, %v88_v45   ;;  %649 = vmatprep.mubr.bf16.mxu1 %v875_v11 }
  0x2b   :  { %137 = vperm.xlu0 %855, %v71_v47  }
  0x2c   :  { %838 = vmatmul.mubr.msk.bf16.gmra.mrb[16].mxu0 %vm335_vm0, %v866_v44 }
  0x2d   :  { %841 = vmatprep.mubr.msk.bf16.mxu0 %vm335_vm0, %v867_v46 }
  0x2e   :  { %142 = vperm.xlu1 %856, %v72_v48  }
  0x2f   :  { %227 = vperm.xlu0 %855, %v89_v49  }
  0x32   :  { %232 = vperm.xlu1 %856, %v90_v51  }
  0x33   :  { %147 = vperm.xlu0 %855, %v73_v53  }
  0x34   :  { %842 = vmatmul.mubr.msk.bf16.gmra.mrb[20].mxu0 %vm335_vm0, %v868_v50 }
  0x35   :  { %845 = vmatprep.mubr.msk.bf16.mxu0 %vm335_vm0, %v869_v52 }
  0x36   :  { %152 = vperm.xlu1 %856, %v74_v54  }
  0x37   :  { %237 = vperm.xlu0 %855, %v91_v55  }
  0x3a   :  { %242 = vperm.xlu1 %856, %v92_v57  }
  0x3b   :  { %157 = vperm.xlu0 %855, %v75_v59  }
  0x3c   :  { %846 = vmatmul.mubr.msk.bf16.gmra.mrb[24].mxu0 %vm335_vm0, %v870_v56 }
  0x3d   :  { %849 = vmatprep.mubr.msk.bf16.mxu0 %vm335_vm0, %v871_v58 }
  0x3e   :  { %162 = vperm.xlu1 %856, %v76_v60  }
  0x3f   :  { %247 = vperm.xlu0 %855, %v93_v61  }
  0x42   :  { %252 = vperm.xlu1 %856, %v94_v63  }
  0x43   :  { %167 = vperm.xlu0 %855, %v77_v0  }
  0x44   :  { %850 = vmatmul.mubr.msk.bf16.gmra.mrb[28].mxu0 %vm335_vm0, %v872_v62 }
  0x46   :  { %172 = vperm.xlu1 %856, %v78_v1  }
  0x47   :  { %599 = vperm.xlu0 %855, %v595_v2  }
  0x4a   :  { %604 = vperm.xlu1 %856, %v596_v3  }
  0x83   :  { %v1191_v4 = vpop.permute.xlu0 %177 }
  0x84   :  { %v98_v5 = vpop.permute.xlu1 %97 }
  0x87   :  { %v1193_v6 = vpop.permute.xlu0 %182 }
  0x88   :  { %v103_v7 = vpop.permute.xlu1 %102 }
  0x8b   :  { %v1195_v8 = vpop.permute.xlu0 %187 }
  0x8c   :  { %v1197_v9 = vpop.permute.xlu1 %192 }
  0x8f   :  { %v108_v10 = vpop.permute.xlu0 %107 }
  0x90   :  { %v113_v12 = vpop.permute.xlu1 %112 }
  0x93   :  { %v1202_v13 = vpop.permute.xlu0 %197 }
  0x94   :  { %v1204_v14 = vpop.permute.xlu1 %202 }
  0x97   :  { %v118_v15 = vpop.permute.xlu0 %117 }
  0x9d   :  { %v123_v16 = vpop.permute.xlu1 %122 }
  0x9e   :  { %v1206_v17 = vpop.permute.xlu0 %207 }
  0xa1   :  { %v1208_v18 = vpop.permute.xlu1 %212 }
  0xa2   :  { %v128_v20 = vpop.permute.xlu0 %127 }
  0xa5   :  { %v133_v21 = vpop.permute.xlu1 %132 }
  0xa6   :  { %v1210_v22 = vpop.permute.xlu0 %217 }
  0xa9   :  { %v1212_v23 = vpop.permute.xlu1 %222 }
  0xaa   :  { %v138_v24 = vpop.permute.xlu0 %137 }
  0xad   :  { %v143_v25 = vpop.permute.xlu1 %142 }
  0xae   :  { %v1214_v26 = vpop.permute.xlu0 %227 }
  0xb1   :  { %v1216_v27 = vpop.permute.xlu1 %232 }
  0xb2   :  { %v148_v28 = vpop.permute.xlu0 %147 }
  0xb5   :  { %v153_v32 = vpop.permute.xlu1 %152 }
  0xb6   :  { %v1218_v38 = vpop.permute.xlu0 %237 }
  0xb9   :  { %v1220_v39 = vpop.permute.xlu1 %242 }
  0xba   :  { %v158_v47 = vpop.permute.xlu0 %157 }
  0xbd   :  { %v163_v51 = vpop.permute.xlu1 %162 }
  0xbe   :  { %v1234_v59 = vpop.permute.xlu0 %247 }
  0xc1   :  { %v1236_v0 = vpop.permute.xlu1 %252 }
  0xdf   :  { %v823_v29 = vpop.f32.mrb[0].mxu0 }
  0xe0   :  { %v427_v30 = vadd.f32 %v823_v29, %v108_v10  ;;  %v418_v31 = vpop.f32.mrb[1].mxu0  ;;  %v168_v10 = vpop.permute.xlu0 %167 }
  0xe1   :  { %v419_v33 = vadd.f32 %v418_v31, %v98_v5  ;;  %v824_v34 = vpop.f32.mrb[2].mxu0 }
  0xe2   :  { %876 = vtanh.f32 %v427_v30  ;;  %v430_v35 = vadd.f32 %v824_v34, %v113_v12  ;;  %v421_v36 = vpop.f32.mrb[3].mxu0 }
  0xe3   :  { %878 = vtanh.f32 %v419_v33  ;;  %v422_v37 = vadd.f32 %v421_v36, %v103_v7 }
  0xe4   :  { %880 = vtanh.f32 %v430_v35 }
  0xe5   :  { %882 = vtanh.f32 %v422_v37 }
  0xe7   :  { %v827_v40 = vpop.f32.mrb[4].mxu0 }
  0xe8   :  { %v443_v41 = vadd.f32 %v827_v40, %v128_v20  ;;  %v434_v42 = vpop.f32.mrb[5].mxu0 }
  0xe9   :  { %v435_v43 = vadd.f32 %v434_v42, %v118_v15  ;;  %v828_v44 = vpop.f32.mrb[6].mxu0 }
  0xea   :  { %884 = vtanh.f32 %v443_v41  ;;  %v446_v45 = vadd.f32 %v828_v44, %v133_v21  ;;  %v437_v46 = vpop.f32.mrb[7].mxu0  ;;  %v173_v21 = vpop.permute.xlu1 %172 }
  0xeb   :  { %886 = vtanh.f32 %v435_v43  ;;  %v438_v48 = vadd.f32 %v437_v46, %v123_v16 }
  0xec   :  { %v1222_v49 = vpop.eup %876  ;;  %888 = vtanh.f32 %v446_v45 }
  0xed   :  { %v1224_v50 = vpop.eup %878  ;;  %890 = vtanh.f32 %v438_v48 }
  0xee   :  { %v1226_v52 = vpop.eup %880 }
  0xef   :  { %v1228_v53 = vpop.eup %882  ;;  %v831_v54 = vpop.f32.mrb[8].mxu0  ;;  %v580_v55 = vpack.c.bf16 %v1226_v52, %v1222_v49 }
  0xf0   :  { %v459_v56 = vadd.f32 %v831_v54, %v148_v28  ;;  %v450_v57 = vpop.f32.mrb[9].mxu0  ;;  %v579_v58 = vpack.c.bf16 %v1228_v53, %v1224_v50 }
  0xf1   :  { %v451_v60 = vadd.f32 %v450_v57, %v138_v24  ;;  %v832_v61 = vpop.f32.mrb[10].mxu0 }
  0xf2   :  { %892 = vtanh.f32 %v459_v56  ;;  %v462_v62 = vadd.f32 %v832_v61, %v153_v32  ;;  %v453_v63 = vpop.f32.mrb[11].mxu0 }
  0xf3   :  { %894 = vtanh.f32 %v451_v60  ;;  %v454_v1 = vadd.f32 %v453_v63, %v143_v25 }
  0xf4   :  { %v1238_v2 = vpop.eup %884  ;;  %896 = vtanh.f32 %v462_v62 }
  0xf5   :  { %v1240_v3 = vpop.eup %886  ;;  %898 = vtanh.f32 %v454_v1 }
  0xf6   :  { %v1242_v5 = vpop.eup %888 }
  0xf7   :  { %v1244_v7 = vpop.eup %890  ;;  %v835_v11 = vpop.f32.mrb[12].mxu0  ;;  %v582_v12 = vpack.c.bf16 %v1242_v5, %v1238_v2  ;;  %v873_v2 = vld [vmem:[%s1344_s4] ss:$8 sps:$4 sm:$0xff]  }
  0xf8   :  { %v475_v15 = vadd.f32 %v835_v11, %v168_v10  ;;  %v466_v16 = vpop.f32.mrb[13].mxu0  ;;  %v581_v20 = vpack.c.bf16 %v1244_v7, %v1240_v3 }
  0xf9   :  { %v467_v24 = vadd.f32 %v466_v16, %v158_v47  ;;  %v836_v25 = vpop.f32.mrb[14].mxu0 }
  0xfa   :  { %900 = vtanh.f32 %v475_v15  ;;  %v478_v28 = vadd.f32 %v836_v25, %v173_v21  ;;  %v469_v29 = vpop.f32.mrb[15].mxu0 }
  0xfb   :  { %902 = vtanh.f32 %v467_v24  ;;  %v470_v30 = vadd.f32 %v469_v29, %v163_v51 }
  0xfc   :  { %v1250_v31 = vpop.eup %892  ;;  %904 = vtanh.f32 %v478_v28 }
  0xfd   :  { %v1252_v32 = vpop.eup %894  ;;  %906 = vtanh.f32 %v470_v30 }
  0xfe   :  { %v1254_v33 = vpop.eup %896 }
  0xff   :  { %v1256_v34 = vpop.eup %898  ;;  %v839_v35 = vpop.f32.mrb[16].mxu0  ;;  %v584_v36 = vpack.c.bf16 %v1254_v33, %v1250_v31 }
 0x100   :  { %v491_v37 = vadd.f32 %v839_v35, %v1195_v8  ;;  %v482_v40 = vpop.f32.mrb[17].mxu0  ;;  %v583_v41 = vpack.c.bf16 %v1256_v34, %v1252_v32  ;;  %v600_v33 = vpop.permute.xlu0 %599 }
 0x101   :  { %v483_v42 = vadd.f32 %v482_v40, %v1191_v4  ;;  %v840_v43 = vpop.f32.mrb[18].mxu0 }
 0x102   :  { %908 = vtanh.f32 %v491_v37  ;;  %v494_v44 = vadd.f32 %v840_v43, %v1197_v9  ;;  %v485_v45 = vpop.f32.mrb[19].mxu0 }
 0x103   :  { %910 = vtanh.f32 %v483_v42  ;;  %v486_v46 = vadd.f32 %v485_v45, %v1193_v6 }
 0x104   :  { %v1266_v47 = vpop.eup %900  ;;  %912 = vtanh.f32 %v494_v44 }
 0x105   :  { %v1268_v48 = vpop.eup %902  ;;  %914 = vtanh.f32 %v486_v46 }
 0x106   :  { %v1270_v8 = vpop.eup %904 }
 0x107   :  { %v1272_v51 = vpop.eup %906  ;;  %v843_v54 = vpop.f32.mrb[20].mxu0  ;;  %v586_v4 = vpack.c.bf16 %v1270_v8, %v1266_v47 }
 0x108   :  { %v507_v9 = vadd.f32 %v843_v54, %v1206_v17  ;;  %v498_v56 = vpop.f32.mrb[21].mxu0  ;;  %v585_v6 = vpack.c.bf16 %v1272_v51, %v1268_v48  ;;  %v605_v48 = vpop.permute.xlu1 %604 }
 0x109   :  { %v499_v57 = vadd.f32 %v498_v56, %v1202_v13  ;;  %v844_v60 = vpop.f32.mrb[22].mxu0 }
 0x10a   :  { %916 = vtanh.f32 %v507_v9  ;;  %v510_v61 = vadd.f32 %v844_v60, %v1208_v18  ;;  %v501_v62 = vpop.f32.mrb[23].mxu0 }
 0x10b   :  { %918 = vtanh.f32 %v499_v57  ;;  %v502_v63 = vadd.f32 %v501_v62, %v1204_v14  ;;  %v776_v62 = vld [vmem:[%s1341_s1] ss:$0 sm:$0xff]  ;;  %s971_s1 = smov [#allocation2]  }
 0x10c   :  { %v909_v1 = vpop.eup %908  ;;  %920 = vtanh.f32 %v510_v61  ;;  %s734_s0 = sshll.u32 %s971_s1, 4  ;;  %s735_s0 = int_to_ptr.vmem [resolvable:$true] %s734_s0 }
 0x10d   :  { %v911_v10 = vpop.eup %910  ;;  %922 = vtanh.f32 %v502_v63  ;;  %s946_s7 = scalar_lea.vmem %s735_s0, 16  ;;  %s950_s8 = scalar_lea.vmem %s735_s0, 32 }
 0x10e   :  { %v913_v11 = vpop.eup %912  ;;  %p947_p0 = scmp.ne.s32.totalorder %s735_s0, %s946_s7  ;;  %p951_p1 = scmp.lt.s32.totalorder %s735_s0, %s735_s0 }
 0x10f   :  { %v915_v17 = vpop.eup %914  ;;  %v847_v15 = vpop.f32.mrb[24].mxu0  ;;  %v588_v16 = vpack.c.bf16 %v913_v11, %v909_v1  ;;  %p952_p2 = scmp.lt.s32.totalorder %s950_s8, %s946_s7 }
 0x110   :  { %v523_v21 = vadd.f32 %v847_v15, %v1214_v26  ;;  %v514_v24 = vpop.f32.mrb[25].mxu0  ;;  %v587_v13 = vpack.c.bf16 %v915_v17, %v911_v10 }
 0x111   :  { %v515_v25 = vadd.f32 %v514_v24, %v1210_v22  ;;  %v848_v28 = vpop.f32.mrb[26].mxu0  ;;  %p953_p3 = por %p952_p2, %p951_p1 }
 0x112   :  { %924 = vtanh.f32 %v523_v21  ;;  %v526_v18 = vadd.f32 %v848_v28, %v1216_v27  ;;  %v517_v29 = vpop.f32.mrb[27].mxu0  ;;  %795 = vmatprep.subr.bf16.mxu1 %v587_v13 }
 0x113   :  { %926 = vtanh.f32 %v515_v25  ;;  %v518_v14 = vadd.f32 %v517_v29, %v1212_v23  ;;  %796 = vmatpush3.bf16.msra.mxu1 %v579_v58  ;;  %p954_p4 = pnand %p953_p3, %p947_p0 }
 0x114   :  { %v917_v30 = vpop.eup %916  ;;  %928 = vtanh.f32 %v526_v18  ;;  %797 = vmatprep.subr.bf16.mxu1 %v588_v16 }
 0x115   :  { %v919_v26 = vpop.eup %918  ;;  %930 = vtanh.f32 %v518_v14 }
 0x116   :  { %v921_v35 = vpop.eup %920 }
 0x117   :  { %v923_v22 = vpop.eup %922  ;;  %v851_v37 = vpop.f32.mrb[28].mxu0  ;;  %798 = vmatpush3.bf16.msra.mxu1 %v580_v55  ;;  %v590_v27 = vpack.c.bf16 %v921_v35, %v917_v30 }
 0x118   :  { %v539_v40 = vadd.f32 %v851_v37, %v1234_v59  ;;  %v530_v23 = vpop.f32.mrb[29].mxu0  ;;  %v589_v42 = vpack.c.bf16 %v923_v22, %v919_v26  ;;  %v717_v26 = vrot.slane %v1030_v19, 4 }
 0x119   :  { %v531_v50 = vadd.f32 %v530_v23, %v1218_v38  ;;  %v852_v53 = vpop.f32.mrb[30].mxu0 }
 0x11a   :  { %932 = vtanh.f32 %v539_v40  ;;  %v542_v58 = vadd.f32 %v852_v53, %v1236_v0  ;;  %v533_v43 = vpop.f32.mrb[31].mxu0  ;;  %799 = vmatprep.subr.bf16.mxu1 %v589_v42 }
 0x11b   :  { %934 = vtanh.f32 %v531_v50  ;;  %v534_v44 = vadd.f32 %v533_v43, %v1220_v39  ;;  %800 = vmatpush3.bf16.msra.mxu1 %v581_v20 }
 0x11c   :  { %v925_v49 = vpop.eup %924  ;;  %936 = vtanh.f32 %v542_v58  ;;  %801 = vmatprep.subr.bf16.mxu1 %v590_v27  ;;  %v718_v27 = vadd.f32 %v717_v26, %v1030_v19 }
 0x11d   :  { %v927_v52 = vpop.eup %926  ;;  %938 = vtanh.f32 %v534_v44 }
 0x11e   :  { %v929_v55 = vpop.eup %928  ;;  %v719_v50 = vrot.slane %v718_v27, 2 }
 0x11f   :  { %v931_v38 = vpop.eup %930  ;;  %802 = vmatpush3.bf16.msra.mxu1 %v582_v12  ;;  %v592_v59 = vpack.c.bf16 %v929_v55, %v925_v49 }
 0x120   :  { %v591_v0 = vpack.c.bf16 %v931_v38, %v927_v52  ;;  %v720_v44 = vadd.f32 %v719_v50, %v718_v27 }
 0x122   :  { %803 = vmatprep.subr.bf16.mxu1 %v591_v0  ;;  %v721_v52 = vrot.slane %v720_v44, 1 }
 0x123   :  { %804 = vmatpush3.bf16.msra.mxu1 %v583_v41 }
 0x124   :  { %v933_v39 = vpop.eup %932  ;;  %805 = vmatprep.subr.bf16.mxu1 %v592_v59  ;;  %v722_v38 = vadd.f32 %v721_v52, %v720_v44 }
 0x125   :  { %v935_v3 = vpop.eup %934 }
 0x126   :  { %v937_v7 = vpop.eup %936 }
 0x127   :  { %v939_v20 = vpop.eup %938  ;;  %806 = vmatpush3.bf16.msra.mxu1 %v584_v36  ;;  %v594_v45 = vpack.c.bf16 %v937_v7, %v933_v39 }
 0x128   :  { %v593_v46 = vpack.c.bf16 %v939_v20, %v935_v3  ;;  %v724_v3 = vmul.f32 0.5, %v722_v38 }
 0x12a   :  { %807 = vmatprep.subr.bf16.mxu1 %v593_v46 }
 0x12b   :  { %808 = vmatpush3.bf16.msra.mxu1 %v585_v6  ;;  %v659_v6 = vlaneseq }
 0x12c   :  { %809 = vmatprep.subr.bf16.mxu1 %v594_v45 }
 0x12d   :  { %v660_v8 = vshrl.u32 %v659_v6, 7 }
 0x12f   :  { %810 = vmatpush3.bf16.msra.mxu1 %v586_v4  ;;  %v661_v61 = vadd.s32 8, %v660_v8  ;;  %vm666_vm2 = vcmp.eq.s32.totalorder %v660_v8, %v776_v62 }
 0x131   :  { %vm667_vm3 = vcmp.eq.s32.totalorder %v661_v61, %v776_v62 }
 0x132   :  { %650 = vmatmul.mubr.bf16.vlgmr.msra.gmra.mrb[0].mxu1 %v873_v2 }
 0x205   :  { %v811_v5 = vpop.f32.mrb[0].mxu1 }
 0x206   :  { %v812_v12 = vpop.f32.mrb[1].mxu1 }
 0x207   :  { %v813_v31 = vadd.f32 %v812_v12, %v811_v5  ;;  %v814_v32 = vpop.f32.mrb[2].mxu1 }
 0x208   :  { %v815_v34 = vpop.f32.mrb[3].mxu1 }
 0x209   :  { %v652_v36 = vadd.f32 %v813_v31, %v600_v33  ;;  %v816_v41 = vadd.f32 %v815_v34, %v814_v32 }
 0x20b   :  { %v655_v51 = vadd.f32 %v816_v41, %v605_v48  ;;  %v669_v54 = vsel %vm668_vm1, %v652_v36, -inf }
 0x20d   :  { %v670_v9 = vsel %vm668_vm1, %v655_v51, -inf }
 0x20e   :  { %v671_v56 = vmax.f32 %v669_v54, %v670_v9 }
 0x210   :  { %v672_v57 = vrot.slane %v671_v56, 4 }
 0x212   :  { %v673_v47 = vmax.f32 %v671_v56, %v672_v57 }
 0x214   :  { %v674_v4 = vrot.slane %v673_v47, 2 }
 0x216   :  { %v675_v60 = vmax.f32 %v673_v47, %v674_v4 }
 0x218   :  { %v676_v63 = vrot.slane %v675_v60, 1 }
 0x21a   :  { %v677_v1 = vmax.f32 %v675_v60, %v676_v63 }
 0x21c   :  { %v678_v10 = vsub.f32 %v652_v36, %v677_v1  ;;  %v679_v11 = vsub.f32 %v655_v51, %v677_v1 }
 0x21e   :  { %v680_v17 = vsel %vm666_vm2, %v678_v10, 0.0  ;;  %v681_v15 = vsel %vm667_vm3, %v679_v11, 0.0  ;;  %v691_v16 = vmul.f32 1.442695, %v678_v10  ;;  %v693_v21 = vmul.f32 1.442695, %v679_v11 }
 0x21f   :  { %v682_v24 = vsel %vm668_vm1, %v680_v17, 0.0  ;;  %v683_v13 = vsel %vm668_vm1, %v681_v15, 0.0 }
 0x220   :  { %v684_v25 = vadd.f32 %v683_v13, %v682_v24  ;;  %940 = vpow2.f32 %v691_v16 }
 0x221   :  { %942 = vpow2.f32 %v693_v21 }
 0x222   :  { %v685_v37 = vrot.slane %v684_v25, 4 }
 0x224   :  { %v686_v42 = vadd.f32 %v685_v37, %v684_v25 }
 0x226   :  { %v687_v43 = vrot.slane %v686_v42, 2 }
 0x228   :  { %v688_v49 = vadd.f32 %v687_v43, %v686_v42 }
 0x22a   :  { %v941_v28 = vpop.eup %940  ;;  %v689_v55 = vrot.slane %v688_v49, 1 }
 0x22b   :  { %v943_v18 = vpop.eup %942  ;;  %v695_v29 = vsel %vm668_vm1, %v941_v28, 0.0 }
 0x22c   :  { %v696_v14 = vsel %vm668_vm1, %v943_v18, 0.0  ;;  %v690_v0 = vadd.f32 %v689_v55, %v688_v49 }
 0x22d   :  { %v697_v30 = vadd.f32 %v696_v14, %v695_v29 }
 0x22f   :  { %v698_v35 = vrot.slane %v697_v30, 4 }
 0x231   :  { %v699_v22 = vadd.f32 %v698_v35, %v697_v30 }
 0x233   :  { %v700_v40 = vrot.slane %v699_v22, 2 }
 0x235   :  { %v701_v23 = vadd.f32 %v700_v40, %v699_v22 }
 0x237   :  { %v702_v53 = vrot.slane %v701_v23, 1 }
 0x239   :  { %v703_v58 = vadd.f32 %v702_v53, %v701_v23 }
 0x23b   :  { %944 = vlog2.f32 %v703_v58 }
 0x245   :  { %v945_v59 = vpop.eup %944 }
 0x246   :  { %v705_v39 = vmul.f32 0.6931472, %v945_v59 }
 0x248   :  { %v723_v19 = vsub.f32 %v690_v0, %v705_v39 }
 0x24a   :  { %v725_v7 = vsub.f32 %v723_v19, %v724_v3 }
 0x24c   :  { %727 = vst.msk [vmem:[#allocation2] sm:$0x1] %vm726_vm4, %v725_v7 }
 0x24d   :  { %957 = shalt.err (!%p954_p4)
}
 0x24e   :  { %s958_s11 = scalar_lea.hbm %s1346_s6, 16 }
 0x24f   :  { %p959_p5 = scmp.ne.s32.totalorder %s1346_s6, %s958_s11  ;;  %p962_p6 = scmp.lt.u32.totalorder %s958_s11, %s1346_s6 }
 0x251   :  { %p964_p7 = pnand %p962_p6, %p959_p5 }
 0x253   :  { %967 = shalt.err (!%p964_p7)
}
 0x254   :  { %737 = dma.vmem_to_hbm [thread:$0]  %s735_s0, 16, %s1346_s6, [#allocation3]  }
 0x255   :  { %968 = dma.done.wait [#allocation3], 16  }
 0x256   :  { %969 = vsyncadd [#allocation3], 4294967280 }
 0x257   :  { %741 = vsyncpa [#allocation3], 1 }

</bundles_post_ra>
